<compile_context>
chip_gen: v5e
topology: v5e:2x2
jax: 0.10.0
libtpu: 0.0.40
codegen_flags: <defaults>
</compile_context>

<pallas_src>
import functools

import jax
import jax.numpy as jnp
from jax import lax
from jax.experimental import pallas as pl
from jax.experimental.pallas import tpu as pltpu


def _down_conv_kernel(params_ref, s_ref, x_ref, o_ref, *, lhs_dtype, precision):
    # params_ref: (r_blk, 3)   VMEM f32 -- [scale, bias, alpha] per output row
    # s_ref:      (wb, wbo)    VMEM     -- 0/1 selection matrix, S[i, j] = (i == 2*j)
    # x_ref:      (r_blk, wb)  VMEM     -- even-row input columns (raw dtype)
    # o_ref:      (r_blk, wbo) VMEM
    x = x_ref[...].astype(lhs_dtype)
    # Stride-2 column subsample as one long-M exact selection matmul (MXU,
    # hidden under the block DMA for these block sizes).
    y = jnp.dot(x, s_ref[...], preferred_element_type=jnp.float32,
                precision=precision)                       # (r_blk, wbo) f32
    # Fused depthwise 1x1 conv + BatchNorm (per-channel affine) + PReLU,
    # vectorized over the whole row block via a lane broadcast.
    scale = params_ref[:, 0:1]                             # (r_blk, 1)
    bias = params_ref[:, 1:2]
    alpha = params_ref[:, 2:3]
    y = y * scale + bias
    o_ref[...] = jnp.where(y > 0.0, y, alpha * y).astype(o_ref.dtype)


def _tpu_hints():
    """Returns (target input-block bytes, allow 256-wide output tiles, VMEM capacity)."""
    vmem_cap = 128 * 1024 * 1024
    try:
        vmem_cap = int(pltpu.get_tpu_info().vmem_capacity_bytes)
    except Exception:
        pass
    kind = ""
    try:
        kind = jax.devices()[0].device_kind.lower()
    except Exception:
        pass
    is_v7 = ("v7" in kind) or ("7x" in kind) or (vmem_cap <= 64 * 1024 * 1024)
    is_v6 = ("v6" in kind) or ("trillium" in kind)
    if is_v7 or is_v6:
        # 8 MiB input blocks: double-buffered footprint ~24 MiB, fits the
        # default scoped limits and v7x's 64 MiB physical VMEM with headroom.
        return 8 * 1024 * 1024, True, vmem_cap
    # v5e / unknown chip: conservative (fits 16 MiB default scoped VMEM,
    # 128-wide MXU tiles only).
    return 4 * 1024 * 1024, False, vmem_cap


def down_conv(x_nchw, conv_w, bn_gamma, bn_beta, bn_mean, bn_var, prelu_alpha,
              *, eps=1e-3):
    n, c, h, w = x_nchw.shape
    assert h % 2 == 0, "Down_Conv Pallas kernel expects even H"
    # TODO(synk): odd-H inputs (PyTorch stride-2 allows them) would need a tail
    #             path for the final even row; not implemented.
    h_out = h // 2
    w_out = (w + 1) // 2
    nc = n * c
    rows = nc * h_out
    out_dtype = x_nchw.dtype
    itemsize = jnp.dtype(x_nchw.dtype).itemsize
    out_itemsize = jnp.dtype(out_dtype).itemsize

    # ---- fold depthwise 1x1 conv + BatchNorm into a per-channel affine -------
    conv_w = conv_w.reshape(-1).astype(jnp.float32)
    g = bn_gamma.astype(jnp.float32)
    inv_std = 1.0 / jnp.sqrt(bn_var.astype(jnp.float32) + eps)
    scale = conv_w * g * inv_std
    bias = bn_beta.astype(jnp.float32) - bn_mean.astype(jnp.float32) * g * inv_std
    alpha = prelu_alpha.reshape(-1).astype(jnp.float32)
    params_c = jnp.stack([scale, bias, alpha], axis=1)                  # (C, 3)
    # One packed [scale, bias, alpha] triple per *output row* (tiny vs x traffic,
    # re-fetched only when the row block changes).
    params = jnp.broadcast_to(params_c[None, :, None, :],
                              (n, c, h_out, 3)).reshape(rows, 3)

    # ---- free reshape: (N,C,H,W) -> (N*C*H/2, 2*W) ----------------------------
    # Each row is [even input row | odd input row]; only even-row columns are
    # ever selected, and in the tiled path the odd half is never DMA'd.
    x_r = x_nchw.reshape(rows, 2 * w)

    target_bytes, wide_ok, vmem_cap = _tpu_hints()

    # ---- matmul dtype / precision ---------------------------------------------
    if x_nchw.dtype == jnp.bfloat16:
        lhs_dtype = jnp.bfloat16            # 0/1 selection is exact in bf16
        s_dtype = jnp.bfloat16
        precision = None
    else:
        lhs_dtype = jnp.float32
        s_dtype = jnp.float32
        precision = lax.Precision.HIGHEST   # keep the f32 selection bit-exact

    # ---- W (lane) blocking: lane-dense output slabs, even-row-only reads ------
    if wide_ok and lhs_dtype == jnp.bfloat16 and w_out % 256 == 0:
        wbo, wb = 256, 512                  # fill the 256-wide MXU on v6e/v7x
    elif w_out % 128 == 0:
        wbo, wb = 128, 256
    else:
        # Small / ragged W: a single full-width block.
        # TODO(synk): stores are <128 lanes here (masked vst); fine for small
        #             layers, suboptimal for large ragged widths.
        wbo = w_out
        wb = w if w % 128 == 0 else 2 * w   # skip the odd-row half when possible
    num_wb = pl.cdiv(w_out, wbo)

    # exact stride-2 column-selection matrix (0/1), constant across the grid
    s_mat = (jnp.arange(wb)[:, None] == 2 * jnp.arange(wbo)[None, :]).astype(s_dtype)

    # ---- row (sublane) blocking: large blocks, multiples of 8 rows ------------
    max_rows = max(1, target_bytes // (wb * itemsize))
    if rows <= max_rows:
        r_blk = rows
    else:
        r_blk = max(8, (max_rows // 8) * 8)
    num_rb = pl.cdiv(rows, r_blk)

    # ---- VMEM budget / cost hint ----------------------------------------------
    in_blk = r_blk * wb * itemsize
    out_blk = r_blk * wbo * out_itemsize
    const_blk = wb * wbo * jnp.dtype(s_dtype).itemsize + r_blk * 3 * 4
    footprint = 2 * (in_blk + out_blk + const_blk)        # double-buffered
    vmem_limit = int(min(vmem_cap * 3 // 4,
                         max(32 * 1024 * 1024, footprint * 3 // 2)))
    cost = pl.CostEstimate(
        flops=int(2 * rows * wbo * num_wb * wb),
        transcendentals=0,
        bytes_accessed=int(rows * (wb * num_wb * itemsize
                                   + w_out * out_itemsize + 12)
                           + wb * wbo * jnp.dtype(s_dtype).itemsize),
    )

    kernel = functools.partial(_down_conv_kernel,
                               lhs_dtype=lhs_dtype, precision=precision)

    out = pl.pallas_call(
        kernel,
        out_shape=jax.ShapeDtypeStruct((rows, w_out), out_dtype),
        grid_spec=pltpu.PrefetchScalarGridSpec(
            num_scalar_prefetch=0,
            grid=(num_rb, num_wb),
            in_specs=[
                # per-row [scale, bias, alpha]
                pl.BlockSpec((r_blk, 3), lambda i, k: (i, 0)),
                # selection matrix, fetched once (constant block index)
                pl.BlockSpec((wb, wbo), lambda i, k: (0, 0)),
                # even-row input columns only
                pl.BlockSpec((r_blk, wb), lambda i, k: (i, k)),
            ],
            out_specs=pl.BlockSpec((r_blk, wbo), lambda i, k: (i, k)),
        ),
        compiler_params=pltpu.CompilerParams(
            dimension_semantics=("parallel", "parallel"),
            vmem_limit_bytes=vmem_limit),
        cost_estimate=cost,
    )(params, s_mat, x_r)

    return out.reshape(n, c, h_out, w_out)


if __name__ == "__main__":
    N, C, H, W = 2, 4, 16, 16

    key = jax.random.PRNGKey(0)
    k_x, k_w, k_g, k_b, k_m, k_v = jax.random.split(key, 6)

    x = jax.random.normal(k_x, (N, C, H, W), dtype=jnp.float32)

    # Conv2d(C, C, 1, stride=2, groups=C, bias=False) weight: (C,1,1,1) -> (C,)
    conv_w = 0.5 * jax.random.normal(k_w, (C,), dtype=jnp.float32)
    # BatchNorm2d(C, eps=1e-3) parameters / running stats
    bn_gamma = 1.0 + 0.1 * jax.random.normal(k_g, (C,), dtype=jnp.float32)
    bn_beta = 0.1 * jax.random.normal(k_b, (C,), dtype=jnp.float32)
    bn_mean = 0.1 * jax.random.normal(k_m, (C,), dtype=jnp.float32)
    bn_var = jnp.abs(jax.random.normal(k_v, (C,), dtype=jnp.float32)) + 0.5
    # PReLU(C) default init
    prelu_alpha = jnp.full((C,), 0.25, dtype=jnp.float32)

    out = down_conv(x, conv_w, bn_gamma, bn_beta, bn_mean, bn_var, prelu_alpha)
    out = jax.block_until_ready(out)
    assert out.shape == (N, C, H // 2, W // 2), out.shape

    # Pure-JAX reference (same inference-mode BN semantics).
    x_s = x[:, :, ::2, ::2]
    y = x_s * conv_w[None, :, None, None]
    y = (y - bn_mean[None, :, None, None]) / jnp.sqrt(bn_var + 1e-3)[None, :, None, None]
    y = y * bn_gamma[None, :, None, None] + bn_beta[None, :, None, None]
    y_ref = jnp.where(y > 0, y, prelu_alpha[None, :, None, None] * y)
    assert jnp.allclose(out, y_ref, atol=1e-5, rtol=1e-5), \
        float(jnp.max(jnp.abs(out - y_ref)))

    print("KERNEL_OK")
</pallas_src>

<mosaic_0001>
module attributes {stable_mosaic.version = 11 : i64} {
  func.func @_down_conv_kernel(%arg0: i32, %arg1: i32, %arg2: memref<64x3xf32, #tpu.memory_space<vmem>>, %arg3: memref<32x8xf32, #tpu.memory_space<vmem>>, %arg4: memref<64x32xf32, #tpu.memory_space<vmem>>, %arg5: memref<64x8xf32, #tpu.memory_space<vmem>>) attributes {dimension_semantics = [#tpu.dimension_semantics<parallel>, #tpu.dimension_semantics<parallel>], iteration_bounds = array<i64: 1, 1>, scalar_prefetch = 0 : i64, scratch_operands = 0 : i64, tpu.core_type = #tpu.core_type<tc>, window_params = [{transform_indices = @transform_0, window_bounds = array<i64: 64, 3>}, {pipeline_mode = #tpu.pipeline_mode<synchronous>, transform_indices = @transform_1, window_bounds = array<i64: 32, 8>}, {transform_indices = @transform_2, window_bounds = array<i64: 64, 32>}, {transform_indices = @transform_3, window_bounds = array<i64: 64, 8>}]} {
    %c0 = arith.constant 0 : index
    %c0_0 = arith.constant 0 : index
    %0 = vector.load %arg4[%c0, %c0_0] : memref<64x32xf32, #tpu.memory_space<vmem>>, vector<64x32xf32>
    %c0_1 = arith.constant 0 : index
    %c0_2 = arith.constant 0 : index
    %1 = vector.load %arg3[%c0_1, %c0_2] : memref<32x8xf32, #tpu.memory_space<vmem>>, vector<32x8xf32>
    %cst = arith.constant dense<0.000000e+00> : vector<64x8xf32>
    %2 = tpu.matmul %0, %1, %cst {dimension_numbers = #tpu.dot_dimension_numbers<[1], [0], [0], [1], [0, 0, 1, 1], [], []>, precision = #tpu.contract_precision<fp32>} : vector<64x32xf32>, vector<32x8xf32>, vector<64x8xf32> -> vector<64x8xf32>
    %c0_3 = arith.constant 0 : index
    %c0_4 = arith.constant 0 : index
    %3 = vector.load %arg2[%c0_3, %c0_4] : memref<64x3xf32, #tpu.memory_space<vmem>>, vector<64x1xf32>
    %c0_5 = arith.constant 0 : index
    %c1 = arith.constant 1 : index
    %4 = vector.load %arg2[%c0_5, %c1] : memref<64x3xf32, #tpu.memory_space<vmem>>, vector<64x1xf32>
    %c0_6 = arith.constant 0 : index
    %c2 = arith.constant 2 : index
    %5 = vector.load %arg2[%c0_6, %c2] : memref<64x3xf32, #tpu.memory_space<vmem>>, vector<64x1xf32>
    %6 = vector.broadcast %3 : vector<64x1xf32> to vector<64x8xf32>
    %7 = arith.mulf %2, %6 : vector<64x8xf32>
    %8 = vector.broadcast %4 : vector<64x1xf32> to vector<64x8xf32>
    %9 = arith.addf %7, %8 : vector<64x8xf32>
    %cst_7 = arith.constant 0.000000e+00 : f32
    %10 = vector.broadcast %cst_7 : f32 to vector<64x8xf32>
    %11 = arith.cmpf ogt, %9, %10 : vector<64x8xf32>
    %12 = vector.broadcast %5 : vector<64x1xf32> to vector<64x8xf32>
    %13 = arith.mulf %12, %9 : vector<64x8xf32>
    %14 = arith.select %11, %9, %13 : vector<64x8xi1>, vector<64x8xf32>
    %c0_8 = arith.constant 0 : index
    %c0_9 = arith.constant 0 : index
    %15 = vector.load %arg5[%c0_8, %c0_9] : memref<64x8xf32, #tpu.memory_space<vmem>>, vector<64x8xf32>
    tpu.vector_store %arg5[%c0_8, %c0_9], %14 {strides = array<i32>} : memref<64x8xf32, #tpu.memory_space<vmem>>, vector<64x8xf32>,
    return
  }
  func.func @transform_0(%arg0: i32, %arg1: i32) -> (i32, i32) {
    %c0_i32 = arith.constant 0 : i32
    %c0_i32_0 = arith.constant 0 : i32
    return %arg0, %c0_i32 : i32, i32
  }
  func.func @transform_1(%arg0: i32, %arg1: i32) -> (i32, i32) {
    %c0_i32 = arith.constant 0 : i32
    %c0_i32_0 = arith.constant 0 : i32
    %c0_i32_1 = arith.constant 0 : i32
    return %c0_i32, %c0_i32_0 : i32, i32
  }
  func.func @transform_2(%arg0: i32, %arg1: i32) -> (i32, i32) {
    %c0_i32 = arith.constant 0 : i32
    return %arg0, %arg1 : i32, i32
  }
  func.func @transform_3(%arg0: i32, %arg1: i32) -> (i32, i32) {
    %c0_i32 = arith.constant 0 : i32
    return %arg0, %arg1 : i32, i32
  }
}

</mosaic_0001>

<bundles_post_ra>
// kernel: tpu_custom_call.1
= control target key start
LH: loop header
LB: loop body
LE: loop exit
PB: predicated region body
PF: predicated region fallthrough
CT: control target
= control target key end

     0   :  { %vm26_vm0 = vcmask 261120   ;;  %v638_v58 = vmov 0   ;;  %vm605_vm1 = vcmask 64512   ;;  %s995_s1 = inlined_call_operand.vmem [shape: f32[32,8], index: 1, kind: input, shape index: {}]   ;;  %s996_s2 = inlined_call_operand.vmem [shape: f32[64,32], index: 2, kind: input, shape index: {}]   ;;  %s997_s0 = inlined_call_operand.vmem [shape: f32[64,3], index: 0, kind: input, shape index: {}]   ;;  %s998_s3 = inlined_call_operand.vmem [shape: f32[64,8], index: 3, kind: output, shape index: {}]  }
   0x1   :  { %v25_v0 = vld [vmem:[%s995_s1 + $0x18] sm:$0xff]  ;;  %v24_v1 = vld [vmem:[%s995_s1 + $0x10] sm:$0xff]  ;;  %v23_v2 = vld [vmem:[%s995_s1 + $0x8] sm:$0xff]  ;;  %630 = vset.pattern.permute.xlu1 %v638_v58  ;;  %629 = vset.pattern.permute.xlu0 %v638_v58 }
   0x2   :  { %v670_v3 = vand.u32 4294901760, %v25_v0  ;;  %v672_v4 = vand.u32 4294901760, %v24_v1  ;;  %v674_v5 = vand.u32 4294901760, %v23_v2  ;;  %v22_v6 = vld [vmem:[%s995_s1] sm:$0xff]  ;;  %v19_v8 = vld [vmem:[%s996_s2 + $0x28] sm:$0xff]  ;;  %v20_v13 = vld [vmem:[%s996_s2 + $0x30] sm:$0xff]  ;;  %631 = vset.pattern.permute.xlu2 %v638_v58 }
   0x3   :  { %v18_v7 = vld [vmem:[%s996_s2 + $0x20] sm:$0xff]  ;;  %v685_v9 = vand.u32 4294901760, %v22_v6  ;;  %v43_v11 = vsel %vm26_vm0, %v19_v8, 0  ;;  %v46_v21 = vsel %vm26_vm0, %v20_v13, 0  ;;  %v15_v36 = vld [vmem:[%s996_s2 + $0x8] sm:$0xff]  ;;  %v16_v42 = vld [vmem:[%s996_s2 + $0x10] sm:$0xff] }
   0x4   :  { %v40_v10 = vsel %vm26_vm0, %v18_v7, 0  ;;  %v14_v12 = vld [vmem:[%s996_s2] sm:$0xff]  ;;  %618 = vmatpush.msra.mxu2 %v670_v3  ;;  %v149_v14 = vsub.f32 %v25_v0, %v670_v3  ;;  %v155_v16 = vsub.f32 %v24_v1, %v672_v4  ;;  %v701_v17 = vsub.f32 %v23_v2, %v674_v5  ;;  %64 = vmatpush.msra.mxu0 %v670_v3  ;;  %v21_v46 = vld [vmem:[%s996_s2 + $0x38] sm:$0xff]  ;;  %v796_v7 = vld [vmem:[%s997_s0 + $0x10] sm:$0xff] }
   0x5   :  { %v697_v15 = vand.u32 4294901760, %v40_v10  ;;  %v705_v18 = vsub.f32 %v22_v6, %v685_v9  ;;  %v707_v19 = vand.u32 4294901760, %v43_v11  ;;  %v28_v20 = vsel %vm26_vm0, %v14_v12, 0  ;;  %v17_v57 = vld [vmem:[%s996_s2 + $0x18] sm:$0xff]  ;;  %473 = vperm.xlu1 %630, %v796_v7  }
   0x6   :  { %619 = vmatpush.msra.mxu2 %v672_v4  ;;  %v150_v22 = vand.u32 4294901760, %v149_v14  ;;  %v156_v24 = vand.u32 4294901760, %v155_v16  ;;  %v162_v25 = vand.u32 4294901760, %v701_v17  ;;  %66 = vmatpush.msra.mxu0 %v672_v4  ;;  %v721_v28 = vand.u32 4294901760, %v28_v20 }
   0x7   :  { %v713_v23 = vsub.f32 %v40_v10, %v697_v15  ;;  %v168_v26 = vand.u32 4294901760, %v705_v18  ;;  %v719_v27 = vsub.f32 %v43_v11, %v707_v19  ;;  %v735_v35 = vand.u32 4294901760, %v46_v21  ;;  %v810_v11 = vld [vmem:[%s997_s0] sm:$0xff] }
   0x8   :  { %620 = vmatpush.msra.mxu2 %v674_v5  ;;  %v151_v29 = vsub.f32 %v149_v14, %v150_v22  ;;  %v157_v31 = vsub.f32 %v155_v16, %v156_v24  ;;  %v163_v32 = vsub.f32 %v701_v17, %v162_v25  ;;  %68 = vmatpush.msra.mxu0 %v674_v5  ;;  %v31_v45 = vsel %vm26_vm0, %v15_v36, 0 }
   0x9   :  { %v105_v30 = vand.u32 4294901760, %v713_v23  ;;  %v169_v33 = vsub.f32 %v705_v18, %v168_v26  ;;  %v733_v34 = vsub.f32 %v28_v20, %v721_v28  ;;  %v113_v40 = vand.u32 4294901760, %v719_v27  ;;  %463 = vperm.xlu0 %629, %v810_v11  }
   0xa   :  { %621 = vmatpush.msra.mxu2 %v685_v9  ;;  %v152_v37 = vand.u32 4294901760, %v151_v29  ;;  %v158_v39 = vand.u32 4294901760, %v157_v31  ;;  %70 = vmatpush.msra.mxu0 %v685_v9  ;;  %v164_v44 = vand.u32 4294901760, %v163_v32  ;;  %v757_v48 = vand.u32 4294901760, %v31_v45  ;;  %v459_v29 = vld [vmem:[%s997_s0 + $0x30] sm:$0xff] }
   0xb   :  { %v106_v38 = vsub.f32 %v713_v23, %v105_v30  ;;  %v73_v41 = vand.u32 4294901760, %v733_v34  ;;  %v170_v49 = vand.u32 4294901760, %v169_v33  ;;  %v114_v50 = vsub.f32 %v719_v27, %v113_v40 }
   0xc   :  { %219 = vmatpush.msrb.mxu2 %v149_v14  ;;  %354 = vmatpush.msrb.mxu0 %v150_v22  ;;  %v763_v51 = vsub.f32 %v46_v21, %v735_v35  ;;  %v34_v52 = vsel %vm26_vm0, %v16_v42, 0  ;;  %v768_v54 = vsub.f32 %v31_v45, %v757_v48  ;;  %v49_v55 = vsel %vm26_vm0, %v21_v46, 0  ;;  %v454_v21 = vld [vmem:[%s997_s0 + $0x8] sm:$0xff] }
   0xd   :  { %622 = vmatpush.msra.mxu3 %v152_v37  ;;  %v107_v43 = vand.u32 4294901760, %v106_v38  ;;  %153 = vmatpush.msra.mxu1 %v152_v37  ;;  %v74_v47 = vsub.f32 %v733_v34, %v73_v41  ;;  %v771_v56 = vand.u32 4294901760, %v34_v52  ;;  %v115_v61 = vand.u32 4294901760, %v114_v50 }
   0xe   :  { %222 = vmatpush.msrb.mxu2 %v155_v16  ;;  %358 = vmatpush.msrb.mxu0 %v156_v24  ;;  %v81_v59 = vand.u32 4294901760, %v768_v54  ;;  %v121_v62 = vand.u32 4294901760, %v763_v51  ;;  %v781_v63 = vand.u32 4294901760, %v49_v55  ;;  %v37_v0 = vsel %vm26_vm0, %v17_v57, 0  ;;  %v833_v16 = vld [vmem:[%s997_s0 + $0x20] sm:$0xff] }
   0xf   :  { %108 = vmatmul.f32.vlgmr.msra.gmra.mxu2 %v107_v43  ;;  %623 = vmatpush.msra.mxu3 %v158_v39  ;;  %v75_v53 = vand.u32 4294901760, %v74_v47  ;;  %v778_v60 = vsub.f32 %v34_v52, %v771_v56  ;;  %v798_v8 = vand.u32 4294901760, %v37_v0  ;;  %v639_v31 = vmov 1  }
  0x10   :  { %159 = vmatpush.msra.mxu1 %v158_v39  ;;  %225 = vmatpush.msrb.mxu2 %v701_v17  ;;  %v82_v1 = vsub.f32 %v768_v54, %v81_v59  ;;  %v122_v10 = vsub.f32 %v763_v51, %v121_v62 }
  0x11   :  { %624 = vmatpush.msra.mxu3 %v164_v44  ;;  %76 = vmatmul.f32.vlgmr.msra.gmra.mxu0 %v75_v53  ;;  %v89_v6 = vand.u32 4294901760, %v778_v60  ;;  %v822_v13 = vsub.f32 %v37_v0, %v798_v8 }
  0x12   :  { %165 = vmatpush.msra.mxu1 %v164_v44  ;;  %228 = vmatpush.msrb.mxu2 %v705_v18  ;;  %v83_v2 = vand.u32 4294901760, %v82_v1  ;;  %v123_v14 = vand.u32 4294901760, %v122_v10 }
  0x13   :  { %625 = vmatpush.msra.mxu3 %v170_v49  ;;  %362 = vmatpush.msrb.mxu0 %v162_v25  ;;  %v90_v12 = vsub.f32 %v778_v60, %v89_v6  ;;  %v97_v20 = vand.u32 4294901760, %v822_v13 }
  0x14   :  { %189 = vmatmul.f32.vlgmr.msra.gmra.mxu3 %v697_v15  ;;  %171 = vmatpush.msra.mxu1 %v170_v49 }
  0x15   :  { %283 = vmatpush.msrb.mxu3 %v670_v3  ;;  %173 = vmatmul.f32.vlgmr.msra.gmra.mxu1 %v721_v28  ;;  %v91_v17 = vand.u32 4294901760, %v90_v12  ;;  %v98_v22 = vsub.f32 %v822_v13, %v97_v20 }
  0x16   :  { %413 = vmatpush.msrb.mxu1 %v670_v3  ;;  %v805_v3 = vsub.f32 %v49_v55, %v781_v63  ;;  %366 = vmatpush.msrb.mxu0 %v168_v26  ;;  %v460_v26 = vld [vmem:[%s997_s0 + $0x38] sm:$0xff] }
  0x17   :  { %116 = vmatmul.f32.gmra.mxu2 %v115_v61  ;;  %285 = vmatpush.msrb.mxu3 %v672_v4  ;;  %v99_v25 = vand.u32 4294901760, %v98_v22 }
  0x18   :  { %415 = vmatpush.msrb.mxu1 %v672_v4  ;;  %v129_v4 = vand.u32 4294901760, %v805_v3  ;;  %483 = vperm.xlu2 %631, %v833_v16  }
  0x19   :  { %287 = vmatpush.msrb.mxu3 %v674_v5  ;;  %84 = vmatmul.f32.gmra.mxu0 %v83_v2 }
  0x1a   :  { %417 = vmatpush.msrb.mxu1 %v674_v5  ;;  %v456_v5 = vld [vmem:[%s997_s0 + $0x18] sm:$0xff]  ;;  %v130_v18 = vsub.f32 %v805_v3, %v129_v4  ;;  %468 = vperm.xlu0 %629, %v454_v21  }
  0x1b   :  { %289 = vmatpush.msrb.mxu3 %v685_v9  ;;  %478 = vperm.xlu1 %630, %v456_v5  }
  0x1c   :  { %193 = vmatmul.f32.gmra.mxu3 %v707_v19  ;;  %419 = vmatpush.msrb.mxu1 %v685_v9  ;;  %v131_v24 = vand.u32 4294901760, %v130_v18  ;;  %v458_v9 = vld [vmem:[%s997_s0 + $0x28] sm:$0xff] }
  0x1d   :  { %177 = vmatmul.f32.gmra.mxu1 %v757_v48 }
  0x1f   :  { %124 = vmatmul.f32.gmra.mxu2 %v123_v14 }
  0x20   :  { %488 = vperm.xlu2 %631, %v458_v9  }
  0x21   :  { %92 = vmatmul.f32.gmra.mxu0 %v91_v17 }
  0x22   :  { %493 = vperm.xlu0 %629, %v459_v29  }
  0x23   :  { %498 = vperm.xlu1 %630, %v460_v26  }
  0x24   :  { %197 = vmatmul.f32.gmra.mxu3 %v735_v35 }
  0x25   :  { %181 = vmatmul.f32.gmra.mxu1 %v771_v56 }
  0x27   :  { %132 = vmatmul.f32.gmra.mxu2 %v131_v24 }
  0x28   :  { %632 = vset.pattern.permute.xlu2 %v639_v31 }
  0x29   :  { %100 = vmatmul.f32.gmra.mxu0 %v99_v25  ;;  %510 = vperm.xlu2 %632, %v810_v11  }
  0x2a   :  { %633 = vset.pattern.permute.xlu0 %v639_v31 }
  0x2b   :  { %634 = vset.pattern.permute.xlu1 %v639_v31  ;;  %514 = vperm.xlu0 %633, %v454_v21  }
  0x2c   :  { %201 = vmatmul.f32.gmra.mxu3 %v781_v63  ;;  %518 = vperm.xlu1 %634, %v796_v7  }
  0x2d   :  { %185 = vmatmul.f32.gmra.mxu1 %v798_v8 }
  0x2f   :  { %231 = vmatmul.f32.vlgmr.msrb.gmra.mxu2 %v733_v34 }
  0x31   :  { %368 = vmatmul.f32.vlgmr.msrb.gmra.mxu0 %v721_v28  ;;  %522 = vperm.xlu2 %632, %v456_v5  }
  0x33   :  { %534 = vperm.xlu0 %633, %v459_v29  }
  0x34   :  { %293 = vmatmul.f32.vlgmr.msrb.gmra.mxu3 %v73_v41  ;;  %526 = vperm.xlu1 %634, %v833_v16  }
  0x35   :  { %421 = vmatmul.f32.vlgmr.msrb.gmra.mxu1 %v721_v28  ;;  %v640_v28 = vmov 2  }
  0x37   :  { %236 = vmatmul.f32.gmra.mxu2 %v768_v54 }
  0x39   :  { %372 = vmatmul.f32.gmra.mxu0 %v757_v48  ;;  %530 = vperm.xlu2 %632, %v458_v9  }
  0x3b   :  { %636 = vset.pattern.permute.xlu0 %v640_v28 }
  0x3c   :  { %299 = vmatmul.f32.gmra.mxu3 %v81_v59  ;;  %538 = vperm.xlu1 %634, %v460_v26  }
  0x3d   :  { %425 = vmatmul.f32.gmra.mxu1 %v757_v48  ;;  %562 = vperm.xlu0 %636, %v454_v21  }
  0x3f   :  { %241 = vmatmul.f32.gmra.mxu2 %v778_v60 }
  0x41   :  { %376 = vmatmul.f32.gmra.mxu0 %v771_v56  ;;  %635 = vset.pattern.permute.xlu2 %v640_v28 }
  0x42   :  { %558 = vperm.xlu2 %635, %v810_v11  }
  0x44   :  { %305 = vmatmul.f32.gmra.mxu3 %v89_v6  ;;  %637 = vset.pattern.permute.xlu1 %v640_v28 }
  0x45   :  { %429 = vmatmul.f32.gmra.mxu1 %v771_v56  ;;  %566 = vperm.xlu1 %637, %v796_v7  }
  0x46   :  { %582 = vperm.xlu0 %636, %v459_v29  }
  0x47   :  { %246 = vmatmul.f32.gmra.mxu2 %v822_v13 }
  0x49   :  { %380 = vmatmul.f32.gmra.mxu0 %v798_v8 }
  0x4a   :  { %570 = vperm.xlu2 %635, %v456_v5  }
  0x4c   :  { %311 = vmatmul.f32.gmra.mxu3 %v97_v20 }
  0x4d   :  { %433 = vmatmul.f32.gmra.mxu1 %v798_v8  ;;  %574 = vperm.xlu1 %637, %v833_v16  }
  0x4f   :  { %251 = vmatmul.f32.gmra.mxu2 %v713_v23 }
  0x51   :  { %384 = vmatmul.f32.gmra.mxu0 %v697_v15 }
  0x52   :  { %578 = vperm.xlu2 %635, %v458_v9  }
  0x54   :  { %317 = vmatmul.f32.gmra.mxu3 %v105_v30 }
  0x55   :  { %437 = vmatmul.f32.gmra.mxu1 %v697_v15  ;;  %586 = vperm.xlu1 %637, %v460_v26  }
  0x57   :  { %256 = vmatmul.f32.gmra.mxu2 %v719_v27 }
  0x59   :  { %388 = vmatmul.f32.gmra.mxu0 %v707_v19 }
  0x5c   :  { %323 = vmatmul.f32.gmra.mxu3 %v113_v40 }
  0x5d   :  { %441 = vmatmul.f32.gmra.mxu1 %v707_v19 }
  0x5f   :  { %261 = vmatmul.f32.gmra.mxu2 %v763_v51 }
  0x61   :  { %392 = vmatmul.f32.gmra.mxu0 %v735_v35 }
  0x64   :  { %329 = vmatmul.f32.gmra.mxu3 %v121_v62 }
  0x65   :  { %445 = vmatmul.f32.gmra.mxu1 %v735_v35 }
  0x67   :  { %266 = vmatmul.f32.gmra.mxu2 %v805_v3 }
  0x69   :  { %396 = vmatmul.f32.gmra.mxu0 %v781_v63 }
  0x6c   :  { %335 = vmatmul.f32.gmra.mxu3 %v129_v4 }
  0x6d   :  { %449 = vmatmul.f32.gmra.mxu1 %v781_v63 }
  0x72   :  { %v906_v15 = vpop.permute.xlu2 %483 }
  0x77   :  { %v908_v23 = vpop.permute.xlu1 %473 }
  0x7a   :  { %v912_v33 = vpop.permute.xlu2 %488 }
  0x7b   :  { %v464_v27 = vpop.permute.xlu0 %463 }
  0x83   :  { %v511_v40 = vpop.permute.xlu2 %510 }
  0x8b   :  { %v930_v49 = vpop.permute.xlu2 %522 }
  0x8c   :  { %v469_v39 = vpop.permute.xlu0 %468 }
  0x8d   :  { %v918_v38 = vpop.permute.xlu1 %478 }
  0x8e   :  { %v77_v19 = vpop.f32.mrf.mxu0 }
  0x92   :  { %v910_v30 = vpop.f32.mrf.mxu2  ;;  %v174_v32 = vpop.f32.mrf.mxu1 }
  0x93   :  { %v175_v58 = vadd.f32 %v174_v32, %v77_v19  ;;  %v936_v59 = vpop.permute.xlu2 %530 }
  0x94   :  { %v926_v46 = vpop.permute.xlu0 %493 }
  0x95   :  { %v924_v45 = vpop.permute.xlu1 %498 }
  0x96   :  { %v85_v35 = vpop.f32.mrf.mxu0 }
  0x97   :  { %v914_v34 = vpop.f32.mrf.mxu3 }
  0x9a   :  { %v916_v36 = vpop.f32.mrf.mxu2  ;;  %v178_v37 = vpop.f32.mrf.mxu1 }
  0x9b   :  { %v179_v7 = vadd.f32 %v178_v37, %v85_v35 }
  0x9c   :  { %v559_v12 = vpop.permute.xlu2 %558 }
  0x9d   :  { %v515_v55 = vpop.permute.xlu0 %514 }
  0x9e   :  { %v93_v42 = vpop.f32.mrf.mxu0  ;;  %v519_v54 = vpop.permute.xlu1 %518 }
  0x9f   :  { %v920_v41 = vpop.f32.mrf.mxu3 }
  0xa2   :  { %v922_v43 = vpop.f32.mrf.mxu2  ;;  %v182_v44 = vpop.f32.mrf.mxu1 }
  0xa3   :  { %v183_v21 = vadd.f32 %v182_v44, %v93_v42 }
  0xa5   :  { %v940_v10 = vpop.permute.xlu0 %534 }
  0xa6   :  { %v101_v48 = vpop.f32.mrf.mxu0  ;;  %v938_v6 = vpop.permute.xlu1 %526 }
  0xa7   :  { %v928_v47 = vpop.f32.mrf.mxu3 }
  0xaa   :  { %v932_v50 = vpop.f32.mrf.mxu2  ;;  %v186_v51 = vpop.f32.mrf.mxu1 }
  0xab   :  { %v187_v42 = vadd.f32 %v186_v51, %v101_v48  ;;  %v191_v51 = vadd.f32 %v914_v34, %v910_v30  ;;  %v195_v34 = vadd.f32 %v920_v41, %v916_v36  ;;  %v199_v41 = vadd.f32 %v928_v47, %v922_v43 }
  0xae   :  { %v369_v53 = vpop.f32.mrf.mxu0  ;;  %v946_v9 = vpop.permute.xlu1 %538 }
  0xaf   :  { %v934_v52 = vpop.f32.mrf.mxu3  ;;  %v563_v29 = vpop.permute.xlu0 %562 }
  0xb2   :  { %v232_v56 = vpop.f32.mrf.mxu2  ;;  %v422_v57 = vpop.f32.mrf.mxu1 }
  0xb3   :  { %v233_v60 = vadd.f32 %v232_v56, %v175_v58 }
  0xb6   :  { %v373_v62 = vpop.f32.mrf.mxu0 }
  0xb7   :  { %v294_v61 = vpop.f32.mrf.mxu3  ;;  %v567_v58 = vpop.permute.xlu1 %566 }
  0xb8   :  { %v295_v63 = vadd.f32 %v294_v61, %v233_v60 }
  0xba   :  { %v237_v0 = vpop.f32.mrf.mxu2  ;;  %v370_v1 = vadd.f32 %v369_v53, %v295_v63  ;;  %v426_v2 = vpop.f32.mrf.mxu1 }
  0xbb   :  { %v238_v3 = vadd.f32 %v237_v0, %v179_v7 }
  0xbc   :  { %v423_v8 = vadd.f32 %v422_v57, %v370_v1 }
  0xbe   :  { %v501_v11 = vmul.f32 %v464_v27, %v423_v8  ;;  %v377_v14 = vpop.f32.mrf.mxu0  ;;  %v571_v8 = vpop.permute.xlu2 %570 }
  0xbf   :  { %v300_v13 = vpop.f32.mrf.mxu3 }
  0xc0   :  { %v541_v4 = vadd.f32 %v511_v40, %v501_v11  ;;  %v301_v16 = vadd.f32 %v300_v13, %v238_v3 }
  0xc2   :  { %v242_v17 = vpop.f32.mrf.mxu2  ;;  %v374_v20 = vadd.f32 %v373_v62, %v301_v16  ;;  %vm549_vm2 = vcmp.gt.f32.partialorder %v541_v4, 0.0  ;;  %v589_v5 = vmul.f32 %v559_v12, %v541_v4  ;;  %v430_v18 = vpop.f32.mrf.mxu1 }
  0xc3   :  { %v243_v25 = vadd.f32 %v242_v17, %v183_v21 }
  0xc4   :  { %v597_v22 = vsel %vm549_vm2, %v541_v4, %v589_v5  ;;  %v427_v24 = vadd.f32 %v426_v2, %v374_v20  ;;  %v575_v5 = vpop.permute.xlu1 %574 }
  0xc5   :  { %606 = vst.msk [vmem:[%s998_s3] sm:$0xff] %vm605_vm1, %v597_v22 }
  0xc6   :  { %v502_v26 = vmul.f32 %v469_v39, %v427_v24  ;;  %v381_v28 = vpop.f32.mrf.mxu0 }
  0xc7   :  { %v306_v31 = vpop.f32.mrf.mxu3 }
  0xc8   :  { %v542_v19 = vadd.f32 %v515_v55, %v502_v26  ;;  %v307_v27 = vadd.f32 %v306_v31, %v243_v25 }
  0xca   :  { %v247_v32 = vpop.f32.mrf.mxu2  ;;  %v378_v35 = vadd.f32 %v377_v14, %v307_v27  ;;  %vm550_vm3 = vcmp.gt.f32.partialorder %v542_v19, 0.0  ;;  %v590_v37 = vmul.f32 %v563_v29, %v542_v19  ;;  %v434_v40 = vpop.f32.mrf.mxu1 }
  0xcb   :  { %v248_v56 = vadd.f32 %v247_v32, %v187_v42 }
  0xcc   :  { %v598_v44 = vsel %vm550_vm3, %v542_v19, %v590_v37  ;;  %v431_v53 = vadd.f32 %v430_v18, %v378_v35  ;;  %v203_v37 = vadd.f32 %v934_v52, %v932_v50 }
  0xcd   :  { %607 = vst.msk [vmem:[%s998_s3 + $0x8] sm:$0xff] %vm605_vm1, %v598_v44 }
  0xce   :  { %v503_v39 = vmul.f32 %v908_v23, %v431_v53  ;;  %v385_v61 = vpop.f32.mrf.mxu0  ;;  %v583_v53 = vpop.permute.xlu0 %582 }
  0xcf   :  { %v312_v57 = vpop.f32.mrf.mxu3 }
  0xd0   :  { %v543_v55 = vadd.f32 %v519_v54, %v503_v39  ;;  %v313_v60 = vadd.f32 %v312_v57, %v248_v56 }
  0xd2   :  { %v252_v62 = vpop.f32.mrf.mxu2  ;;  %v382_v63 = vadd.f32 %v381_v28, %v313_v60  ;;  %vm551_vm4 = vcmp.gt.f32.partialorder %v543_v55, 0.0  ;;  %v591_v0 = vmul.f32 %v567_v58, %v543_v55  ;;  %v438_v48 = vpop.f32.mrf.mxu1 }
  0xd3   :  { %v253_v23 = vadd.f32 %v252_v62, %v191_v51  ;;  %v587_v62 = vpop.permute.xlu1 %586 }
  0xd4   :  { %v599_v1 = vsel %vm551_vm4, %v543_v55, %v591_v0  ;;  %v435_v2 = vadd.f32 %v434_v40, %v382_v63 }
  0xd5   :  { %608 = vst.msk [vmem:[%s998_s3 + $0x10] sm:$0xff] %vm605_vm1, %v599_v1 }
  0xd6   :  { %v504_v54 = vmul.f32 %v918_v38, %v435_v2  ;;  %v389_v30 = vpop.f32.mrf.mxu0 }
  0xd7   :  { %v318_v7 = vpop.f32.mrf.mxu3 }
  0xd8   :  { %v544_v3 = vadd.f32 %v930_v49, %v504_v54  ;;  %v319_v11 = vadd.f32 %v318_v7, %v253_v23 }
  0xda   :  { %v257_v12 = vpop.f32.mrf.mxu2  ;;  %v386_v13 = vadd.f32 %v385_v61, %v319_v11  ;;  %vm552_vm5 = vcmp.gt.f32.partialorder %v544_v3, 0.0  ;;  %v592_v14 = vmul.f32 %v571_v8, %v544_v3  ;;  %v442_v38 = vpop.f32.mrf.mxu1 }
  0xdb   :  { %v258_v17 = vadd.f32 %v257_v12, %v195_v34 }
  0xdc   :  { %v600_v4 = vsel %vm552_vm5, %v544_v3, %v592_v14  ;;  %v439_v16 = vadd.f32 %v438_v48, %v386_v13 }
  0xdd   :  { %609 = vst.msk [vmem:[%s998_s3 + $0x18] sm:$0xff] %vm605_vm1, %v600_v4 }
  0xde   :  { %v505_v49 = vmul.f32 %v906_v15, %v439_v16  ;;  %v393_v15 = vpop.f32.mrf.mxu0 }
  0xdf   :  { %v324_v20 = vpop.f32.mrf.mxu3 }
  0xe0   :  { %v545_v18 = vadd.f32 %v938_v6, %v505_v49  ;;  %v325_v21 = vadd.f32 %v324_v20, %v258_v17  ;;  %v579_v6 = vpop.permute.xlu2 %578 }
  0xe2   :  { %v262_v22 = vpop.f32.mrf.mxu2  ;;  %v390_v24 = vadd.f32 %v389_v30, %v325_v21  ;;  %vm553_vm6 = vcmp.gt.f32.partialorder %v545_v18, 0.0  ;;  %v593_v36 = vmul.f32 %v575_v5, %v545_v18  ;;  %v446_v19 = vpop.f32.mrf.mxu1 }
  0xe3   :  { %v263_v29 = vadd.f32 %v262_v22, %v199_v41 }
  0xe4   :  { %v601_v25 = vsel %vm553_vm6, %v545_v18, %v593_v36  ;;  %v443_v26 = vadd.f32 %v442_v38, %v390_v24 }
  0xe5   :  { %610 = vst.msk [vmem:[%s998_s3 + $0x20] sm:$0xff] %vm605_vm1, %v601_v25 }
  0xe6   :  { %v506_v31 = vmul.f32 %v912_v33, %v443_v26  ;;  %v397_v56 = vpop.f32.mrf.mxu0 }
  0xe7   :  { %v330_v28 = vpop.f32.mrf.mxu3 }
  0xe8   :  { %v546_v27 = vadd.f32 %v936_v59, %v506_v31  ;;  %v331_v32 = vadd.f32 %v330_v28, %v263_v29 }
  0xea   :  { %v394_v35 = vadd.f32 %v393_v15, %v331_v32  ;;  %vm554_vm7 = vcmp.gt.f32.partialorder %v546_v27, 0.0  ;;  %v594_v43 = vmul.f32 %v579_v6, %v546_v27  ;;  %v267_v47 = vpop.f32.mrf.mxu2  ;;  %v450_v58 = vpop.f32.mrf.mxu1 }
  0xeb   :  { %v268_v33 = vadd.f32 %v267_v47, %v203_v37 }
  0xec   :  { %v602_v40 = vsel %vm554_vm7, %v546_v27, %v594_v43  ;;  %v447_v42 = vadd.f32 %v446_v19, %v394_v35 }
  0xed   :  { %611 = vst.msk [vmem:[%s998_s3 + $0x28] sm:$0xff] %vm605_vm1, %v602_v40 }
  0xee   :  { %v507_v44 = vmul.f32 %v926_v46, %v447_v42 }
  0xef   :  { %v336_v59 = vpop.f32.mrf.mxu3 }
  0xf0   :  { %v547_v39 = vadd.f32 %v940_v10, %v507_v44  ;;  %v337_v57 = vadd.f32 %v336_v59, %v268_v33 }
  0xf2   :  { %v398_v55 = vadd.f32 %v397_v56, %v337_v57  ;;  %vm555_vm8 = vcmp.gt.f32.partialorder %v547_v39, 0.0  ;;  %v595_v50 = vmul.f32 %v583_v53, %v547_v39 }
  0xf4   :  { %v603_v52 = vsel %vm555_vm8, %v547_v39, %v595_v50  ;;  %v451_v60 = vadd.f32 %v450_v58, %v398_v55 }
  0xf5   :  { %612 = vst.msk [vmem:[%s998_s3 + $0x30] sm:$0xff] %vm605_vm1, %v603_v52 }
  0xf6   :  { %v508_v61 = vmul.f32 %v924_v45, %v451_v60 }
  0xf8   :  { %v548_v46 = vadd.f32 %v946_v9, %v508_v61 }
  0xfa   :  { %vm556_vm9 = vcmp.gt.f32.partialorder %v548_v46, 0.0  ;;  %v596_v63 = vmul.f32 %v587_v62, %v548_v46 }
  0xfc   :  { %v604_v10 = vsel %vm556_vm9, %v548_v46, %v596_v63 }
  0xfd   :  { %613 = vst.msk [vmem:[%s998_s3 + $0x38] sm:$0xff] %vm605_vm1, %v604_v10 }

</bundles_post_ra>
